<compile_context>
chip_gen: v6e
topology: v6e:2x2x1
jax: 0.10.0
libtpu: 0.0.40
codegen_flags: <defaults>
</compile_context>

<pallas_src>
import jax
import jax.numpy as jnp
from jax import lax
from jax.experimental import pallas as pl
from jax.experimental.pallas import tpu as pltpu


def _round_up(a: int, b: int) -> int:
    return ((a + b - 1) // b) * b


def _vmem_cap_bytes() -> int:
    """Physical VMEM minus headroom (compiler scratch / pipelining)."""
    try:
        phys = int(pltpu.get_tpu_info().vmem_capacity_bytes)
    except Exception:
        phys = 64 << 20  # conservative default (v7x per-TC VMEM)
    # 48 MiB on v7x (64 MiB phys), 96 MiB on v5e/v6e (128 MiB phys).
    return max(phys - phys // 4, 32 << 20)


# ---------------------------------------------------------------------------
# Kernels
# ---------------------------------------------------------------------------
def _splitbias_kernel_f32(x_ref, w_ref, b_ref, o_ref):
    """f32 output: accumulate directly into the resident output tile.

    x_ref: (tm, tk); w_ref: (tk, tn) [pre-transposed]; b_ref: (1, tn) f32.
    """
    k = pl.program_id(2)
    partial = jnp.dot(x_ref[...], w_ref[...], preferred_element_type=jnp.float32)

    @pl.when(k == 0)
    def _():
        o_ref[...] = partial

    @pl.when(k != 0)
    def _():
        o_ref[...] = o_ref[...] + partial

    @pl.when(k == pl.num_programs(2) - 1)
    def _():
        o_ref[...] = o_ref[...] + b_ref[...]


def _splitbias_kernel_acc(x_ref, w_ref, b_ref, o_ref, acc_ref):
    """Narrow-output (e.g. bf16) variant with an f32 VMEM accumulator."""
    k = pl.program_id(2)

    @pl.when(k == 0)
    def _():
        acc_ref[...] = jnp.zeros_like(acc_ref)

    acc_ref[...] += jnp.dot(x_ref[...], w_ref[...],
                            preferred_element_type=jnp.float32)

    @pl.when(k == pl.num_programs(2) - 1)
    def _():
        o_ref[...] = (acc_ref[...] + b_ref[...]).astype(o_ref.dtype)


# ---------------------------------------------------------------------------
# Parameter preparation (amortized: do once per weight/bias, not per call)
# ---------------------------------------------------------------------------
def prepare_splitbias_params(weight, bias, *, tn=1024, tk=1024, compute_dtype=None):
    """Pad / cast / transpose the static parameters once.

    weight: (N, K)  PyTorch nn.Linear layout
    bias:   (N,)
    Returns a dict holding the (Kp, Np) weight, the (1, Np) f32 bias, the
    original dims and the effective N/K tile sizes used for padding.
    """
    N, K = weight.shape
    assert bias.shape == (N,)

    tn_eff = min(tn, _round_up(N, 128))    # lane-dense output / weight minor dim
    tk_eff = min(tk, _round_up(K, 128))
    Np = _round_up(N, tn_eff)
    Kp = _round_up(K, tk_eff)

    w = weight if compute_dtype is None else weight.astype(compute_dtype)
    if (Np, Kp) != (N, K):
        w = jnp.pad(w, ((0, Np - N), (0, Kp - K)))   # zero K-pad is inert for the dot
    w_t = w.T                                        # (Kp, Np): one-time transpose

    b2 = bias.astype(jnp.float32)                    # bias added once, in f32
    if Np != N:
        b2 = jnp.pad(b2, (0, Np - N))
    b2 = b2.reshape(1, Np)

    return {"w_t": w_t, "bias": b2, "N": N, "K": K, "tn": tn_eff, "tk": tk_eff}


# ---------------------------------------------------------------------------
# Forward
# ---------------------------------------------------------------------------
def splitbias_linear_forward(x, params, *, tm=512):
    """y = x @ W.T + bias, with W/bias pre-prepared by prepare_splitbias_params."""
    w_t, b2 = params["w_t"], params["bias"]
    N, K = params["N"], params["K"]
    tn_eff, tk_eff = params["tn"], params["tk"]
    Kp, Np = w_t.shape

    orig_shape = x.shape
    assert orig_shape[-1] == K, "feature dim mismatch"
    x2 = x.reshape(-1, K)
    if x2.dtype != w_t.dtype:
        x2 = x2.astype(w_t.dtype)
    M = x2.shape[0]

    # ---- per-call padding: activation only -------------------------------
    tm_eff = min(tm, _round_up(M, 8))      # sublane-aligned
    Mp = _round_up(M, tm_eff)
    if (Mp, Kp) != (M, K):
        x2 = jnp.pad(x2, ((0, Mp - M), (0, Kp - K)))

    # ---- megacore: make sure both TensorCores (v7x) get at least one tile -
    grid_m = Mp // tm_eff
    grid_n = Np // tn_eff
    while grid_m * grid_n < 2 and tn_eff > 128:
        tn_eff //= 2                       # still a multiple of 128, still divides Np
        grid_n = Np // tn_eff
    grid_k = Kp // tk_eff
    grid = (grid_m, grid_n, grid_k)

    out_dtype = x.dtype
    use_scratch = jnp.dtype(out_dtype) != jnp.dtype(jnp.float32)

    # ---- VMEM budget ------------------------------------------------------
    in_isz = jnp.dtype(x2.dtype).itemsize
    w_isz = jnp.dtype(w_t.dtype).itemsize
    out_isz = jnp.dtype(out_dtype).itemsize
    vmem_need = (2 * tm_eff * tk_eff * in_isz
                 + 2 * tk_eff * tn_eff * w_isz
                 + 2 * tm_eff * tn_eff * out_isz
                 + 2 * tn_eff * 4)
    if use_scratch:
        vmem_need += tm_eff * tn_eff * 4
    vmem_limit = int(min(max(2 * vmem_need, 32 << 20), _vmem_cap_bytes()))

    # ---- cost estimate (includes panel re-fetch factors) ------------------
    cost = pl.CostEstimate(
        flops=2 * Mp * Np * Kp,
        transcendentals=0,
        bytes_accessed=(in_isz * Mp * Kp * grid_n
                        + w_isz * Np * Kp * grid_m
                        + out_isz * Mp * Np
                        + 4 * Np),
    )

    in_specs = [
        pl.BlockSpec((tm_eff, tk_eff), lambda i, j, k: (i, k)),   # x tile
        pl.BlockSpec((tk_eff, tn_eff), lambda i, j, k: (k, j)),   # W.T tile (K,N)
        pl.BlockSpec((1, tn_eff), lambda i, j, k: (0, j)),        # bias tile
    ]
    out_spec = pl.BlockSpec((tm_eff, tn_eff), lambda i, j, k: (i, j))

    if use_scratch:
        kernel = _splitbias_kernel_acc
        scratch_shapes = [pltpu.VMEM((tm_eff, tn_eff), jnp.float32)]
    else:
        kernel = _splitbias_kernel_f32
        scratch_shapes = []

    # TODO(synk): optionally add pipeline_mode=pl.Buffered(3) on the weight
    # BlockSpec for v5e if profiling shows exposed DMA (sweep, not default).
    out = pl.pallas_call(
        kernel,
        out_shape=jax.ShapeDtypeStruct((Mp, Np), out_dtype),
        grid_spec=pltpu.PrefetchScalarGridSpec(
            num_scalar_prefetch=0,
            grid=grid,
            in_specs=in_specs,
            out_specs=out_spec,
            scratch_shapes=scratch_shapes,
        ),
        compiler_params=pltpu.CompilerParams(
            dimension_semantics=("parallel", "parallel", "arbitrary"),
            vmem_limit_bytes=vmem_limit,
        ),
        cost_estimate=cost,
    )(x2, w_t, b2)

    if (Mp, Np) != (M, N):
        out = out[:M, :N]
    return out.reshape(orig_shape[:-1] + (N,))


def splitbias_linear(x, weight, bias, *, tm=512, tn=1024, tk=1024, compute_dtype=None):
    """Convenience one-shot path (prepare + forward). Prefer preparing once."""
    params = prepare_splitbias_params(weight, bias, tn=tn, tk=tk,
                                      compute_dtype=compute_dtype)
    return splitbias_linear_forward(x, params, tm=tm)


# ---------------------------------------------------------------------------
if __name__ == "__main__":
    key = jax.random.PRNGKey(0)

    # --- Shapes implied by the module demo: nn.Linear(32, 32), batch 8 ------
    kx, kw, kb = jax.random.split(key, 3)
    batch, in_features, out_features = 8, 32, 32
    x = jax.random.normal(kx, (batch, in_features), dtype=jnp.float32)
    weight = jax.random.normal(kw, (out_features, in_features), dtype=jnp.float32) * 0.1
    bias = jax.random.normal(kb, (out_features,), dtype=jnp.float32)

    # Prepare the static parameters once (amortized), then forward.
    params = prepare_splitbias_params(weight, bias)
    out = jax.block_until_ready(splitbias_linear_forward(x, params))
    ref = x @ weight.T + bias.reshape(1, -1)
    assert jnp.allclose(out, ref, atol=1e-5, rtol=1e-5), "mismatch vs reference (small)"

    # --- Multi-tile / padded case exercising the 3-D grid + direct-f32 path -
    k2x, k2w, k2b = jax.random.split(jax.random.PRNGKey(1), 3)
    M2, K2, N2 = 100, 192, 160
    x2 = jax.random.normal(k2x, (M2, K2), dtype=jnp.float32)
    w2 = jax.random.normal(k2w, (N2, K2), dtype=jnp.float32) * 0.05
    b2 = jax.random.normal(k2b, (N2,), dtype=jnp.float32)

    out2 = jax.block_until_ready(
        splitbias_linear(x2, w2, b2, tm=64, tn=128, tk=128))
    ref2 = x2 @ w2.T + b2.reshape(1, -1)
    assert jnp.allclose(out2, ref2, atol=1e-4, rtol=1e-4), "mismatch vs reference (tiled)"

    # --- bf16 compute path (scratch f32 accumulator kernel) -----------------
    x3 = x2.astype(jnp.bfloat16)
    out3 = jax.block_until_ready(
        splitbias_linear(x3, w2, b2, tm=64, tn=128, tk=128,
                         compute_dtype=jnp.bfloat16))
    assert out3.shape == (M2, N2)
    assert jnp.allclose(out3.astype(jnp.float32), ref2, atol=0.1, rtol=0.1), \
        "mismatch vs reference (bf16)"

    print("KERNEL_OK")
</pallas_src>

<mosaic_0001>
module attributes {stable_mosaic.version = 11 : i64} {
  func.func @_splitbias_kernel_f32(%arg0: i32, %arg1: i32, %arg2: i32, %arg3: memref<8x128xf32, #tpu.memory_space<vmem>>, %arg4: memref<128x128xf32, #tpu.memory_space<vmem>>, %arg5: memref<1x128xf32, #tpu.memory_space<vmem>>, %arg6: memref<8x128xf32, #tpu.memory_space<vmem>>) attributes {dimension_semantics = [#tpu.dimension_semantics<parallel>, #tpu.dimension_semantics<parallel>, #tpu.dimension_semantics<arbitrary>], iteration_bounds = array<i64: 1, 1, 1>, scalar_prefetch = 0 : i64, scratch_operands = 0 : i64, tpu.core_type = #tpu.core_type<tc>, window_params = [{transform_indices = @transform_0, window_bounds = array<i64: 8, 128>}, {transform_indices = @transform_1, window_bounds = array<i64: 128, 128>}, {transform_indices = @transform_2, window_bounds = array<i64: 1, 128>}, {transform_indices = @transform_3, window_bounds = array<i64: 8, 128>}]} {
    %c0 = arith.constant 0 : index
    %c0_0 = arith.constant 0 : index
    %0 = vector.load %arg3[%c0, %c0_0] : memref<8x128xf32, #tpu.memory_space<vmem>>, vector<8x128xf32>
    %c0_1 = arith.constant 0 : index
    %c0_2 = arith.constant 0 : index
    %1 = vector.load %arg4[%c0_1, %c0_2] : memref<128x128xf32, #tpu.memory_space<vmem>>, vector<128x128xf32>
    %cst = arith.constant dense<0.000000e+00> : vector<8x128xf32>
    %2 = tpu.matmul %0, %1, %cst {dimension_numbers = #tpu.dot_dimension_numbers<[1], [0], [0], [1], [0, 0, 1, 1], [], []>} : vector<8x128xf32>, vector<128x128xf32>, vector<8x128xf32> -> vector<8x128xf32>
    %c0_i32 = arith.constant 0 : i32
    %3 = arith.cmpi eq, %arg2, %c0_i32 : i32
    %4 = arith.extui %3 : i1 to i32
    %c0_i32_3 = arith.constant 0 : i32
    %5 = arith.cmpi ne, %4, %c0_i32_3 : i32
    scf.if %5 {
      %c0_8 = arith.constant 0 : index
      %c0_9 = arith.constant 0 : index
      %12 = vector.load %arg6[%c0_8, %c0_9] : memref<8x128xf32, #tpu.memory_space<vmem>>, vector<8x128xf32>
      tpu.vector_store %arg6[%c0_8, %c0_9], %2 {strides = array<i32>} : memref<8x128xf32, #tpu.memory_space<vmem>>, vector<8x128xf32>,
    } else {
    }
    %c0_i32_4 = arith.constant 0 : i32
    %6 = arith.cmpi ne, %arg2, %c0_i32_4 : i32
    %7 = arith.extui %6 : i1 to i32
    %c0_i32_5 = arith.constant 0 : i32
    %8 = arith.cmpi ne, %7, %c0_i32_5 : i32
    scf.if %8 {
      %c0_8 = arith.constant 0 : index
      %c0_9 = arith.constant 0 : index
      %12 = vector.load %arg6[%c0_8, %c0_9] : memref<8x128xf32, #tpu.memory_space<vmem>>, vector<8x128xf32>
      %13 = arith.addf %12, %2 : vector<8x128xf32>
      %c0_10 = arith.constant 0 : index
      %c0_11 = arith.constant 0 : index
      %14 = vector.load %arg6[%c0_10, %c0_11] : memref<8x128xf32, #tpu.memory_space<vmem>>, vector<8x128xf32>
      tpu.vector_store %arg6[%c0_10, %c0_11], %13 {strides = array<i32>} : memref<8x128xf32, #tpu.memory_space<vmem>>, vector<8x128xf32>,
    } else {
    }
    %c0_i32_6 = arith.constant 0 : i32
    %9 = arith.cmpi eq, %arg2, %c0_i32_6 : i32
    %10 = arith.extui %9 : i1 to i32
    %c0_i32_7 = arith.constant 0 : i32
    %11 = arith.cmpi ne, %10, %c0_i32_7 : i32
    scf.if %11 {
      %c0_8 = arith.constant 0 : index
      %c0_9 = arith.constant 0 : index
      %12 = vector.load %arg6[%c0_8, %c0_9] : memref<8x128xf32, #tpu.memory_space<vmem>>, vector<8x128xf32>
      %c0_10 = arith.constant 0 : index
      %c0_11 = arith.constant 0 : index
      %13 = vector.load %arg5[%c0_10, %c0_11] : memref<1x128xf32, #tpu.memory_space<vmem>>, vector<1x128xf32>
      %14 = vector.broadcast %13 : vector<1x128xf32> to vector<8x128xf32>
      %15 = arith.addf %12, %14 : vector<8x128xf32>
      %c0_12 = arith.constant 0 : index
      %c0_13 = arith.constant 0 : index
      %16 = vector.load %arg6[%c0_12, %c0_13] : memref<8x128xf32, #tpu.memory_space<vmem>>, vector<8x128xf32>
      tpu.vector_store %arg6[%c0_12, %c0_13], %15 {strides = array<i32>} : memref<8x128xf32, #tpu.memory_space<vmem>>, vector<8x128xf32>,
    } else {
    }
    return
  }
  func.func @transform_0(%arg0: i32, %arg1: i32, %arg2: i32) -> (i32, i32) {
    %c0_i32 = arith.constant 0 : i32
    return %arg0, %arg2 : i32, i32
  }
  func.func @transform_1(%arg0: i32, %arg1: i32, %arg2: i32) -> (i32, i32) {
    %c0_i32 = arith.constant 0 : i32
    return %arg2, %arg1 : i32, i32
  }
  func.func @transform_2(%arg0: i32, %arg1: i32, %arg2: i32) -> (i32, i32) {
    %c0_i32 = arith.constant 0 : i32
    %c0_i32_0 = arith.constant 0 : i32
    return %c0_i32, %arg1 : i32, i32
  }
  func.func @transform_3(%arg0: i32, %arg1: i32, %arg2: i32) -> (i32, i32) {
    %c0_i32 = arith.constant 0 : i32
    return %arg0, %arg1 : i32, i32
  }
}

</mosaic_0001>

<bundles_post_ra>
// kernel: tpu_custom_call.1
= control target key start
LH: loop header
LB: loop body
LE: loop exit
PB: predicated region body
PF: predicated region fallthrough
CT: control target
= control target key end

     0   :  { %8 = vsyncpa [#allocation3], 0  ;;  %s334_s0 = inlined_call_operand.hbm [shape: f32[8,128], index: 0, kind: input, shape index: {}]   ;;  %s335_s1 = inlined_call_operand.hbm [shape: f32[128,128], index: 1, kind: input, shape index: {}]   ;;  %s336_s2 = inlined_call_operand.vmem [shape: f32[1,128], index: 2, kind: input, shape index: {}]   ;;  %s337_s3 = inlined_call_operand.hbm [shape: f32[8,128], index: 3, kind: output, shape index: {}]  }
   0x1   :  { %9 = vsyncpa [#allocation6], 0 }
   0x2   :  { %10 = vsyncpa [#allocation4], 0  ;;  %s295_s12 = smov [#allocation2]   ;;  %s296_s14 = smov [#allocation5]  }
   0x3   :  { %s17_s13 = sshll.u32 %s295_s12, 4  ;;  %s26_s15 = sshll.u32 %s296_s14, 4  ;;  %s18_s13 = int_to_ptr.vmem [resolvable:$true] %s17_s13  ;;  %s27_s15 = int_to_ptr.vmem [resolvable:$true] %s26_s15 }
   0x4   :  { %s237_s16 = scalar_lea.vmem %s18_s13, 128  ;;  %p242_p1 = scmp.lt.s32.totalorder %s18_s13, %s18_s13 }
   0x5   :  { %p238_p0 = scmp.ne.s32.totalorder %s18_s13, %s237_s16  ;;  %p243_p2 = scmp.lt.s32.totalorder %s237_s16, %s237_s16 }
   0x7   :  { %p244_p3 = por %p243_p2, %p242_p1 }
   0x9   :  { %p245_p4 = pnand %p244_p3, %p238_p0 }
   0xb   :  { %248 = shalt.err (!%p245_p4)
}
   0xc   :  { %20 = dma.hbm_to_vmem [thread:$0]  %s334_s0, 128, %s18_s13, [#allocation3]  }
   0xd   :  { %s257_s19 = scalar_lea.vmem %s27_s15, 2048  ;;  %p262_p6 = scmp.lt.s32.totalorder %s27_s15, %s27_s15 }
   0xe   :  { %p258_p5 = scmp.ne.s32.totalorder %s27_s15, %s257_s19  ;;  %p263_p7 = scmp.lt.s32.totalorder %s257_s19, %s257_s19 }
  0x10   :  { %p264_p8 = por %p263_p7, %p262_p6 }
  0x12   :  { %p265_p9 = pnand %p264_p8, %p258_p5 }
  0x14   :  { %268 = shalt.err (!%p265_p9)
}
  0x15   :  { %s297_s20 = smov 128   ;;  %s298_s21 = smov 8  }
  0x16   :  { %32 = dma.hbm_to_vmem [thread:$0]  %s335_s1, 2048, %s27_s15, [#allocation6], %s297_s20, %s297_s20, %s298_s21  }
  0x17   :  { %289 = dma.done.wait [#allocation3], 128  }
  0x18   :  { %290 = vsyncadd [#allocation3], 4294967168 }
  0x19   :  { %291 = dma.done.wait [#allocation6], 2048  }
  0x1a   :  { %292 = vsyncadd [#allocation6], 4294965248  ;;  %v299_v0 = vmov 0.0   ;;  %vm300_vm0 = vmmov 0   ;;  %v57_v1 = vld [vmem:[#allocation5 + $0x78] sm:$0xff]  ;;  %v56_v2 = vld [vmem:[#allocation5 + $0x70] sm:$0xff] }
  0x1b   :  { %187 = vmatprep.subr.mxu0 %v299_v0  ;;  %219 = vmatprep.mubr.msk.f32.mxu0 %vm300_vm0, %v299_v0  ;;  %v55_v3 = vld [vmem:[#allocation5 + $0x68] sm:$0xff]  ;;  %v54_v4 = vld [vmem:[#allocation5 + $0x60] sm:$0xff]  ;;  %v53_v5 = vld [vmem:[#allocation5 + $0x58] sm:$0xff]  ;;  %s301_s24 = smov [#allocation7]  }
  0x1c   :  { %188 = vmatpush3.msra.mxu0 %v57_v1  ;;  %v52_v6 = vld [vmem:[#allocation5 + $0x50] sm:$0xff]  ;;  %v51_v7 = vld [vmem:[#allocation5 + $0x48] sm:$0xff]  ;;  %v50_v8 = vld [vmem:[#allocation5 + $0x40] sm:$0xff]  ;;  %s159_s25 = sshll.u32 %s301_s24, 4  ;;  %s160_s25 = int_to_ptr.vmem [resolvable:$true] %s159_s25 }
  0x1d   :  { %189 = vmatprep.subr.mxu0 %v299_v0  ;;  %v49_v9 = vld [vmem:[#allocation5 + $0x38] sm:$0xff]  ;;  %v48_v10 = vld [vmem:[#allocation5 + $0x30] sm:$0xff]  ;;  %v47_v11 = vld [vmem:[#allocation5 + $0x28] sm:$0xff]  ;;  %s269_s26 = scalar_lea.vmem %s160_s25, 128  ;;  %p274_p11 = scmp.lt.s32.totalorder %s160_s25, %s160_s25 }
  0x1e   :  { %190 = vmatpush3.msra.mxu0 %v56_v2  ;;  %v46_v12 = vld [vmem:[#allocation5 + $0x20] sm:$0xff]  ;;  %v45_v13 = vld [vmem:[#allocation5 + $0x18] sm:$0xff]  ;;  %v44_v14 = vld [vmem:[#allocation5 + $0x10] sm:$0xff]  ;;  %p270_p10 = scmp.ne.s32.totalorder %s160_s25, %s269_s26  ;;  %p275_p12 = scmp.lt.s32.totalorder %s269_s26, %s269_s26 }
  0x1f   :  { %191 = vmatprep.subr.mxu0 %v299_v0  ;;  %v43_v15 = vld [vmem:[#allocation5 + $0x8] sm:$0xff]  ;;  %v42_v16 = vld [vmem:[#allocation5] sm:$0xff]  ;;  %v41_v17 = vld [vmem:[#allocation2] sm:$0xff] }
  0x20   :  { %192 = vmatpush3.msra.mxu0 %v55_v3  ;;  %v169_v18 = vld [vmem:[%s336_s2] ss:$0 sm:$0xff]  ;;  %p276_p13 = por %p275_p12, %p274_p11 }
  0x21   :  { %193 = vmatprep.subr.mxu0 %v299_v0 }
  0x22   :  { %194 = vmatpush3.msra.mxu0 %v54_v4  ;;  %p277_p0 = pnand %p276_p13, %p270_p10 }
  0x23   :  { %195 = vmatprep.subr.mxu0 %v299_v0 }
  0x24   :  { %196 = vmatpush3.msra.mxu0 %v53_v5 }
  0x25   :  { %197 = vmatprep.subr.mxu0 %v299_v0 }
  0x26   :  { %198 = vmatpush3.msra.mxu0 %v52_v6 }
  0x27   :  { %199 = vmatprep.subr.mxu0 %v299_v0 }
  0x28   :  { %200 = vmatpush3.msra.mxu0 %v51_v7 }
  0x29   :  { %201 = vmatprep.subr.mxu0 %v299_v0 }
  0x2a   :  { %202 = vmatpush3.msra.mxu0 %v50_v8 }
  0x2b   :  { %203 = vmatprep.subr.mxu0 %v299_v0 }
  0x2c   :  { %204 = vmatpush3.msra.mxu0 %v49_v9 }
  0x2d   :  { %205 = vmatprep.subr.mxu0 %v299_v0 }
  0x2e   :  { %206 = vmatpush3.msra.mxu0 %v48_v10 }
  0x2f   :  { %207 = vmatprep.subr.mxu0 %v299_v0 }
  0x30   :  { %208 = vmatpush3.msra.mxu0 %v47_v11 }
  0x31   :  { %209 = vmatprep.subr.mxu0 %v299_v0 }
  0x32   :  { %210 = vmatpush3.msra.mxu0 %v46_v12 }
  0x33   :  { %211 = vmatprep.subr.mxu0 %v299_v0 }
  0x34   :  { %212 = vmatpush3.msra.mxu0 %v45_v13 }
  0x35   :  { %213 = vmatprep.subr.mxu0 %v299_v0 }
  0x36   :  { %214 = vmatpush3.msra.mxu0 %v44_v14 }
  0x37   :  { %215 = vmatprep.subr.mxu0 %v299_v0 }
  0x38   :  { %216 = vmatpush3.msra.mxu0 %v43_v15 }
  0x39   :  { %217 = vmatprep.subr.mxu0 %v299_v0 }
  0x3a   :  { %218 = vmatpush3.msra.mxu0 %v42_v16 }
  0x3b   :  { %220 = vmatmul.mubr.f32.vlgmr.msra.gmra.mxu0 %v41_v17 }
  0xfb   :  { %v124_v19 = vpop.f32.mrf.mxu0 }
  0xfc   :  { %v151_v20 = vadd.f32 %v169_v18, %v124_v19 }
  0xfd   :  { %v221_v21 = vpop.f32.mrf.mxu0 }
  0xfe   :  { %152 = vst [vmem:[#allocation7] sm:$0xff] %v151_v20 }
  0xff   :  { %280 = shalt.err (!%p277_p0)
}
 0x100   :  { %162 = dma.vmem_to_hbm [thread:$0]  %s160_s25, 128, %s337_s3, [#allocation4]  }
 0x101   :  { %293 = dma.done.wait [#allocation4], 128  }
 0x102   :  { %294 = vsyncadd [#allocation4], 4294967168 }
 0x103   :  { %166 = vsyncpa [#allocation3], 1 }
 0x104   :  { %167 = vsyncpa [#allocation6], 1 }
 0x105   :  { %168 = vsyncpa [#allocation4], 1 }

</bundles_post_ra>
